<compile_context>
chip_gen: v6e
topology: v6e:2x2x1
jax: 0.10.0
libtpu: 0.0.40
codegen_flags: <defaults>
</compile_context>

<pallas_src>
import functools

import jax
import jax.numpy as jnp
from jax.experimental import pallas as pl
from jax.experimental.pallas import tpu as pltpu

N_STATES = 4          # CartPole-v1 observation dim
N_ACTIONS = 2         # CartPole-v1 action count
HIDDEN = 128
K_PAD = 8             # first-layer contraction dim padded 4 -> 8
OUT_PAD = 8           # output dim padded 2 -> 8 (narrow f32 writeback)
SUBLANE = 16          # batch-tile alignment (bf16 packs 16 rows per vreg)
_MIN_ROWS_PER_SPLIT = 512   # only force a >=2-step grid (v7x megacore) above this


def _round_up(n, m):
    return ((n + m - 1) // m) * m


def _cdiv(a, b):
    return (a + b - 1) // b


def mlp_kernel(x_ref, w1_ref, b1_ref, w2_ref, b2_ref, w3_ref, b3_ref, o_ref):
    # One batch tile per grid step; weights/biases are VMEM-resident.
    # x arrives already bf16; bf16 MXU inputs, f32 accumulation throughout.
    h1 = jnp.dot(x_ref[...], w1_ref[...],
                 preferred_element_type=jnp.float32) + b1_ref[...]
    h1 = jnp.maximum(h1, 0.0).astype(jnp.bfloat16)                   # ReLU
    h2 = jnp.dot(h1, w2_ref[...],
                 preferred_element_type=jnp.float32) + b2_ref[...]
    h2 = jnp.maximum(h2, 0.0).astype(jnp.bfloat16)                   # ReLU
    o_ref[...] = jnp.dot(h2, w3_ref[...],
                         preferred_element_type=jnp.float32) + b3_ref[...]


def prepare_params(params):
    """Pad / cast raw f32 params once: K 4->8, output 2->8, weights -> bf16."""
    w1, b1, w2, b2, w3, b3 = params
    w1p = jnp.zeros((K_PAD, HIDDEN), jnp.bfloat16)
    w1p = w1p.at[:N_STATES, :].set(w1.astype(jnp.bfloat16))
    w3p = jnp.zeros((HIDDEN, OUT_PAD), jnp.bfloat16)
    w3p = w3p.at[:, :N_ACTIONS].set(w3.astype(jnp.bfloat16))
    b3p = jnp.zeros((1, OUT_PAD), jnp.float32)
    b3p = b3p.at[:, :N_ACTIONS].set(b3)
    return (w1p, b1, w2.astype(jnp.bfloat16), b2, w3p, b3p)


@functools.partial(jax.jit, static_argnames=("tile_b",))
def net_forward(x, prepared_params, tile_b=2048):
    """x: [B, N_STATES] f32 -> [B, N_ACTIONS] f32 Q-values.

    Note: for tiny per-step action-selection batches (B=1..32) this call is
    launch-latency bound; amortize by batching states or let plain XLA handle it.
    """
    w1, b1, w2, b2, w3, b3 = prepared_params
    B = x.shape[0]
    tile_b = max(SUBLANE, _round_up(int(tile_b), SUBLANE))

    # Evenly-dividing tile choice (avoids ~2x padding cliffs); for large B force
    # at least 2 grid steps so the "parallel" axis can split across v7x's 2 TCs.
    n_tiles = _cdiv(B, tile_b)
    if B >= 2 * _MIN_ROWS_PER_SPLIT:
        n_tiles = max(n_tiles, 2)
    tb = _round_up(_cdiv(B, n_tiles), SUBLANE)
    b_pad = n_tiles * tb
    grid = (n_tiles,)

    # Pad batch to a tile multiple and features to K_PAD, casting to bf16 once
    # in the wrapper (zero columns/rows are mathematically inert and sliced off).
    xp = jnp.zeros((b_pad, K_PAD), jnp.bfloat16)
    xp = xp.at[:B, :N_STATES].set(x.astype(jnp.bfloat16))

    flops = 2 * b_pad * (K_PAD * HIDDEN + HIDDEN * HIDDEN + HIDDEN * OUT_PAD)
    bytes_accessed = (
        2 * b_pad * K_PAD                                              # x (bf16)
        + 2 * (K_PAD * HIDDEN + HIDDEN * HIDDEN + HIDDEN * OUT_PAD)    # weights (bf16)
        + 4 * (HIDDEN + HIDDEN + OUT_PAD)                              # biases (f32)
        + 4 * b_pad * OUT_PAD                                          # output (f32)
    )

    resident = lambda i: (0, 0)   # weights/biases: same block every grid step
    # Note: the six resident specs could use pipeline_mode=pl.Buffered(1) to drop
    # their second buffer (~70 KiB VMEM); left at the default for compatibility.
    out = pl.pallas_call(
        mlp_kernel,
        out_shape=jax.ShapeDtypeStruct((b_pad, OUT_PAD), jnp.float32),
        grid_spec=pltpu.PrefetchScalarGridSpec(
            num_scalar_prefetch=0,
            grid=grid,
            in_specs=[
                pl.BlockSpec((tb, K_PAD), lambda i: (i, 0)),        # x tile (bf16)
                pl.BlockSpec((K_PAD, HIDDEN), resident),             # w1
                pl.BlockSpec((1, HIDDEN), resident),                  # b1
                pl.BlockSpec((HIDDEN, HIDDEN), resident),             # w2
                pl.BlockSpec((1, HIDDEN), resident),                  # b2
                pl.BlockSpec((HIDDEN, OUT_PAD), resident),            # w3 (padded)
                pl.BlockSpec((1, OUT_PAD), resident),                 # b3 (padded)
            ],
            out_specs=pl.BlockSpec((tb, OUT_PAD), lambda i: (i, 0)),
        ),
        compiler_params=pltpu.CompilerParams(
            dimension_semantics=("parallel",),
            # Fits v7x's 64 MiB physical VMEM with headroom; plenty for tb<=8192.
            vmem_limit_bytes=32 * 1024 * 1024,
            # Let XLA fuse the wrapper-side pad/cast of x into the kernel's
            # input DMA instead of a separate HBM round trip.
            allow_input_fusion=[True, False, False, False, False, False, False],
        ),
        cost_estimate=pl.CostEstimate(
            flops=flops, bytes_accessed=bytes_accessed, transcendentals=0),
    )(xp, w1, b1, w2, b2, w3, b3)

    return out[:B, :N_ACTIONS]


def init_params(key):
    """Deterministic init matching PyTorch Linear shapes (stored as [in, out])."""
    ks = jax.random.split(key, 6)

    def linear_init(kw, kb, fan_in, fan_out):
        # PyTorch default: U(-1/sqrt(fan_in), 1/sqrt(fan_in)) for both W and b.
        bound = 1.0 / jnp.sqrt(jnp.float32(fan_in))
        w = jax.random.uniform(kw, (fan_in, fan_out), jnp.float32, -bound, bound)
        b = jax.random.uniform(kb, (1, fan_out), jnp.float32, -bound, bound)
        return w, b

    w1, b1 = linear_init(ks[0], ks[1], N_STATES, HIDDEN)
    w2, b2 = linear_init(ks[2], ks[3], HIDDEN, HIDDEN)
    w3, b3 = linear_init(ks[4], ks[5], HIDDEN, N_ACTIONS)
    return (w1, b1, w2, b2, w3, b3)


def reference_forward_f32(x, params):
    w1, b1, w2, b2, w3, b3 = params
    h1 = jnp.maximum(x @ w1 + b1, 0.0)
    h2 = jnp.maximum(h1 @ w2 + b2, 0.0)
    return h2 @ w3 + b3


def reference_forward_bf16(x, params):
    """Mimics the kernel's bf16-input / f32-accumulate numerics."""
    w1, b1, w2, b2, w3, b3 = params
    bf = jnp.bfloat16
    h1 = jnp.dot(x.astype(bf), w1.astype(bf),
                 preferred_element_type=jnp.float32) + b1
    h1 = jnp.maximum(h1, 0.0)
    h2 = jnp.dot(h1.astype(bf), w2.astype(bf),
                 preferred_element_type=jnp.float32) + b2
    h2 = jnp.maximum(h2, 0.0)
    return jnp.dot(h2.astype(bf), w3.astype(bf),
                   preferred_element_type=jnp.float32) + b3


def _check(q, x, params):
    q_bf16_ref = reference_forward_bf16(x, params)
    assert jnp.allclose(q, q_bf16_ref, atol=2e-3, rtol=2e-3), (
        jnp.max(jnp.abs(q - q_bf16_ref)))
    q_f32_ref = reference_forward_f32(x, params)
    assert jnp.allclose(q, q_f32_ref, atol=5e-2, rtol=5e-2), (
        jnp.max(jnp.abs(q - q_f32_ref)))


if __name__ == "__main__":
    key = jax.random.PRNGKey(0)
    pkey, xkey, xkey2 = jax.random.split(key, 3)
    params = init_params(pkey)
    prepared = prepare_params(params)

    # Small batch of CartPole states.
    B = 8
    x = jax.random.normal(xkey, (B, N_STATES), dtype=jnp.float32)
    q = jax.block_until_ready(net_forward(x, prepared))
    assert q.shape == (B, N_ACTIONS)
    _check(q, x, params)

    # Non-multiple-of-tile batch exercises the padding / even-tile path.
    B2 = 37
    x2 = jax.random.normal(xkey2, (B2, N_STATES), dtype=jnp.float32)
    q2 = jax.block_until_ready(net_forward(x2, prepared))
    assert q2.shape == (B2, N_ACTIONS)
    _check(q2, x2, params)

    print("KERNEL_OK")
</pallas_src>

<mosaic_0001>
module attributes {stable_mosaic.version = 11 : i64} {
  func.func @mlp_kernel(%arg0: i32, %arg1: memref<16x8xbf16, #tpu.memory_space<vmem>>, %arg2: memref<8x128xbf16, #tpu.memory_space<vmem>>, %arg3: memref<1x128xf32, #tpu.memory_space<vmem>>, %arg4: memref<128x128xbf16, #tpu.memory_space<vmem>>, %arg5: memref<1x128xf32, #tpu.memory_space<vmem>>, %arg6: memref<128x8xbf16, #tpu.memory_space<vmem>>, %arg7: memref<1x8xf32, #tpu.memory_space<vmem>>, %arg8: memref<16x8xf32, #tpu.memory_space<vmem>>) attributes {dimension_semantics = [#tpu.dimension_semantics<parallel>], iteration_bounds = array<i64: 1>, scalar_prefetch = 0 : i64, scratch_operands = 0 : i64, tpu.core_type = #tpu.core_type<tc>, window_params = [{transform_indices = @transform_0, window_bounds = array<i64: 16, 8>}, {pipeline_mode = #tpu.pipeline_mode<synchronous>, transform_indices = @transform_1, window_bounds = array<i64: 8, 128>}, {pipeline_mode = #tpu.pipeline_mode<synchronous>, transform_indices = @transform_2, window_bounds = array<i64: 1, 128>}, {pipeline_mode = #tpu.pipeline_mode<synchronous>, transform_indices = @transform_3, window_bounds = array<i64: 128, 128>}, {pipeline_mode = #tpu.pipeline_mode<synchronous>, transform_indices = @transform_4, window_bounds = array<i64: 1, 128>}, {pipeline_mode = #tpu.pipeline_mode<synchronous>, transform_indices = @transform_5, window_bounds = array<i64: 128, 8>}, {pipeline_mode = #tpu.pipeline_mode<synchronous>, transform_indices = @transform_6, window_bounds = array<i64: 1, 8>}, {transform_indices = @transform_7, window_bounds = array<i64: 16, 8>}]} {
    %c0 = arith.constant 0 : index
    %c0_0 = arith.constant 0 : index
    %0 = vector.load %arg1[%c0, %c0_0] : memref<16x8xbf16, #tpu.memory_space<vmem>>, vector<16x8xbf16>
    %c0_1 = arith.constant 0 : index
    %c0_2 = arith.constant 0 : index
    %1 = vector.load %arg2[%c0_1, %c0_2] : memref<8x128xbf16, #tpu.memory_space<vmem>>, vector<8x128xbf16>
    %cst = arith.constant dense<0.000000e+00> : vector<16x128xf32>
    %2 = tpu.matmul %0, %1, %cst {dimension_numbers = #tpu.dot_dimension_numbers<[1], [0], [0], [1], [0, 0, 1, 1], [], []>} : vector<16x8xbf16>, vector<8x128xbf16>, vector<16x128xf32> -> vector<16x128xf32>
    %c0_3 = arith.constant 0 : index
    %c0_4 = arith.constant 0 : index
    %3 = vector.load %arg3[%c0_3, %c0_4] : memref<1x128xf32, #tpu.memory_space<vmem>>, vector<1x128xf32>
    %4 = vector.broadcast %3 : vector<1x128xf32> to vector<16x128xf32>
    %5 = arith.addf %2, %4 : vector<16x128xf32>
    %cst_5 = arith.constant 0.000000e+00 : f32
    %6 = vector.broadcast %cst_5 : f32 to vector<16x128xf32>
    %7 = arith.maximumf %5, %6 : vector<16x128xf32>
    %8 = arith.truncf %7 : vector<16x128xf32> to vector<16x128xbf16>
    %c0_6 = arith.constant 0 : index
    %c0_7 = arith.constant 0 : index
    %9 = vector.load %arg4[%c0_6, %c0_7] : memref<128x128xbf16, #tpu.memory_space<vmem>>, vector<128x128xbf16>
    %cst_8 = arith.constant dense<0.000000e+00> : vector<16x128xf32>
    %10 = tpu.matmul %8, %9, %cst_8 {dimension_numbers = #tpu.dot_dimension_numbers<[1], [0], [0], [1], [0, 0, 1, 1], [], []>} : vector<16x128xbf16>, vector<128x128xbf16>, vector<16x128xf32> -> vector<16x128xf32>
    %c0_9 = arith.constant 0 : index
    %c0_10 = arith.constant 0 : index
    %11 = vector.load %arg5[%c0_9, %c0_10] : memref<1x128xf32, #tpu.memory_space<vmem>>, vector<1x128xf32>
    %12 = vector.broadcast %11 : vector<1x128xf32> to vector<16x128xf32>
    %13 = arith.addf %10, %12 : vector<16x128xf32>
    %cst_11 = arith.constant 0.000000e+00 : f32
    %14 = vector.broadcast %cst_11 : f32 to vector<16x128xf32>
    %15 = arith.maximumf %13, %14 : vector<16x128xf32>
    %16 = arith.truncf %15 : vector<16x128xf32> to vector<16x128xbf16>
    %c0_12 = arith.constant 0 : index
    %c0_13 = arith.constant 0 : index
    %17 = vector.load %arg6[%c0_12, %c0_13] : memref<128x8xbf16, #tpu.memory_space<vmem>>, vector<128x8xbf16>
    %cst_14 = arith.constant dense<0.000000e+00> : vector<16x8xf32>
    %18 = tpu.matmul %16, %17, %cst_14 {dimension_numbers = #tpu.dot_dimension_numbers<[1], [0], [0], [1], [0, 0, 1, 1], [], []>} : vector<16x128xbf16>, vector<128x8xbf16>, vector<16x8xf32> -> vector<16x8xf32>
    %c0_15 = arith.constant 0 : index
    %c0_16 = arith.constant 0 : index
    %19 = vector.load %arg7[%c0_15, %c0_16] : memref<1x8xf32, #tpu.memory_space<vmem>>, vector<1x8xf32>
    %20 = vector.broadcast %19 : vector<1x8xf32> to vector<16x8xf32>
    %21 = arith.addf %18, %20 : vector<16x8xf32>
    %c0_17 = arith.constant 0 : index
    %c0_18 = arith.constant 0 : index
    %22 = vector.load %arg8[%c0_17, %c0_18] : memref<16x8xf32, #tpu.memory_space<vmem>>, vector<16x8xf32>
    tpu.vector_store %arg8[%c0_17, %c0_18], %21 {strides = array<i32>} : memref<16x8xf32, #tpu.memory_space<vmem>>, vector<16x8xf32>,
    return
  }
  func.func @transform_0(%arg0: i32) -> (i32, i32) {
    %c0_i32 = arith.constant 0 : i32
    %c0_i32_0 = arith.constant 0 : i32
    return %arg0, %c0_i32 : i32, i32
  }
  func.func @transform_1(%arg0: i32) -> (i32, i32) {
    %c0_i32 = arith.constant 0 : i32
    %c0_i32_0 = arith.constant 0 : i32
    %c0_i32_1 = arith.constant 0 : i32
    return %c0_i32, %c0_i32_0 : i32, i32
  }
  func.func @transform_2(%arg0: i32) -> (i32, i32) {
    %c0_i32 = arith.constant 0 : i32
    %c0_i32_0 = arith.constant 0 : i32
    %c0_i32_1 = arith.constant 0 : i32
    return %c0_i32, %c0_i32_0 : i32, i32
  }
  func.func @transform_3(%arg0: i32) -> (i32, i32) {
    %c0_i32 = arith.constant 0 : i32
    %c0_i32_0 = arith.constant 0 : i32
    %c0_i32_1 = arith.constant 0 : i32
    return %c0_i32, %c0_i32_0 : i32, i32
  }
  func.func @transform_4(%arg0: i32) -> (i32, i32) {
    %c0_i32 = arith.constant 0 : i32
    %c0_i32_0 = arith.constant 0 : i32
    %c0_i32_1 = arith.constant 0 : i32
    return %c0_i32, %c0_i32_0 : i32, i32
  }
  func.func @transform_5(%arg0: i32) -> (i32, i32) {
    %c0_i32 = arith.constant 0 : i32
    %c0_i32_0 = arith.constant 0 : i32
    %c0_i32_1 = arith.constant 0 : i32
    return %c0_i32, %c0_i32_0 : i32, i32
  }
  func.func @transform_6(%arg0: i32) -> (i32, i32) {
    %c0_i32 = arith.constant 0 : i32
    %c0_i32_0 = arith.constant 0 : i32
    %c0_i32_1 = arith.constant 0 : i32
    return %c0_i32, %c0_i32_0 : i32, i32
  }
  func.func @transform_7(%arg0: i32) -> (i32, i32) {
    %c0_i32 = arith.constant 0 : i32
    %c0_i32_0 = arith.constant 0 : i32
    return %arg0, %c0_i32 : i32, i32
  }
}

</mosaic_0001>

<bundles_post_ra>
// kernel: net_forward.2
= control target key start
LH: loop header
LB: loop body
LE: loop exit
PB: predicated region body
PF: predicated region fallthrough
CT: control target
= control target key end

     0   :  { %s615_s0 = inlined_call_operand.vmem [shape: bf16[8,128], index: 0, kind: input, shape index: {}]   ;;  %s616_s1 = inlined_call_operand.vmem [shape: f32[1,128], index: 1, kind: input, shape index: {}]   ;;  %s617_s2 = inlined_call_operand.vmem [shape: bf16[128,128], index: 2, kind: input, shape index: {}]   ;;  %s618_s3 = inlined_call_operand.vmem [shape: f32[1,128], index: 3, kind: input, shape index: {}]   ;;  %s619_s4 = inlined_call_operand.vmem [shape: bf16[128,8], index: 4, kind: input, shape index: {}]   ;;  %s620_s5 = inlined_call_operand.vmem [shape: f32[1,8], index: 5, kind: input, shape index: {}]   ;;  %s621_s6 = inlined_call_operand.vmem [shape: bf16[8,4], index: 6, kind: input, shape index: {}]   ;;  %s622_s7 = inlined_call_operand.<no memory space> [shape: bf16[], index: 7, kind: input, shape index: {}]   ;;  %s623_s8 = inlined_call_operand.vmem [shape: f32[16,8], index: 8, kind: output, shape index: {}]  }
   0x1   :  { %v13_v0 = vstv %s622_s7 }
   0x2   :  { %v14_v1 = vunpack.i.l.bf16 %v13_v0 }
   0x3   :  { %v61_v2 = vld [vmem:[%s615_s0] sm:$0xf]  ;;  %vm78_vm0 = vcmask 1043456   ;;  %v44_v3 = vlaneseq  ;;  %v454_v4 = vld [vmem:[%s617_s2 + $0x38] sm:$0xff]   ;;  %v470_v5 = vmov 0.0   ;;  %vm471_vm1 = vmmov 0  }
   0x4   :  { %405 = vmatprep.subr.bf16.mxu0 %v470_v5  ;;  %v80_v6 = vsel %vm78_vm0, %v61_v2, 0  ;;  %407 = vmatprep.mubr.msk.bf16.mxu0 %vm471_vm1, %v470_v5  ;;  %v41_v7 = vld [vmem:[%s621_s6] sm:$0xf]  ;;  %v455_v10 = vld [vmem:[%s617_s2 + $0x30] sm:$0xff]   ;;  %v456_v13 = vld [vmem:[%s617_s2 + $0x28] sm:$0xff]   ;;  %vm74_vm3 = vcmask 64512  }
   0x5   :  { %406 = vmatpush3.bf16.msra.mxu0 %v80_v6  ;;  %v42_v8 = vunpack.c.l.bf16 %v41_v7  ;;  %v45_v9 = vand.u32 127, %v44_v3  ;;  %411 = vmatprep.subr.bf16.mxu1 %v470_v5  ;;  %v457_v14 = vld [vmem:[%s617_s2 + $0x20] sm:$0xff]   ;;  %v458_v15 = vld [vmem:[%s617_s2 + $0x18] sm:$0xff]   ;;  %v459_v17 = vld [vmem:[%s617_s2 + $0x10] sm:$0xff]  }
   0x6   :  { %412 = vmatpush3.bf16.msra.mxu1 %v454_v4  ;;  %427 = vmatprep.mubr.msk.bf16.mxu1 %vm471_vm1, %v470_v5  ;;  %v460_v18 = vld [vmem:[%s617_s2 + $0x8] sm:$0xff]   ;;  %v461_v19 = vld [vmem:[%s617_s2] sm:$0xff]   ;;  %v462_v20 = vld [vmem:[%s619_s4 + $0x38] sm:$0xff]  }
   0x7   :  { %vm47_vm2 = vcmp.lt.s32.totalorder %v45_v9, 4  ;;  %413 = vmatprep.subr.bf16.mxu1 %v470_v5  ;;  %431 = vmatprep.subr.bf16.mxu0 %v470_v5  ;;  %v463_v21 = vld [vmem:[%s619_s4 + $0x30] sm:$0xff]   ;;  %v464_v22 = vld [vmem:[%s619_s4 + $0x28] sm:$0xff]   ;;  %v465_v23 = vld [vmem:[%s619_s4 + $0x20] sm:$0xff]  }
   0x8   :  { %v48_v11 = vsel %vm47_vm2, %v42_v8, %v14_v1  ;;  %v466_v24 = vld [vmem:[%s619_s4 + $0x18] sm:$0xff]   ;;  %v359_v25 = vld [vmem:[%s616_s1] ss:$0 sm:$0xff]  ;;  %v467_v35 = vld [vmem:[%s619_s4 + $0x10] sm:$0xff]  }
   0x9   :  { %v383_v12 = vpack.c.bf16 %v14_v1, %v48_v11  ;;  %v468_v36 = vld [vmem:[%s619_s4 + $0x8] sm:$0xff]   ;;  %v469_v37 = vld [vmem:[%s619_s4] sm:$0xff]  }
   0xa   :  { %414 = vmatpush3.bf16.msra.mxu1 %v455_v10  ;;  %v362_v38 = vld [vmem:[%s618_s3] ss:$0 sm:$0xff] }
   0xb   :  { %384 = vst [vmem:[#allocation7] sm:$0xff] %v383_v12   ;;  %415 = vmatprep.subr.bf16.mxu1 %v470_v5  ;;  %v371_v48 = vld [vmem:[%s620_s5] ss:$0 sm:$0xff] }
   0xe   :  { %416 = vmatpush3.bf16.msra.mxu1 %v456_v13 }
   0xf   :  { %417 = vmatprep.subr.bf16.mxu1 %v470_v5 }
  0x12   :  { %v453_v16 = vld [vmem:[#allocation7] sm:$0xff]   ;;  %418 = vmatpush3.bf16.msra.mxu1 %v457_v14 }
  0x13   :  { %419 = vmatprep.subr.bf16.mxu1 %v470_v5  ;;  %408 = vmatmul.mubr.msk.bf16.vlgmr.msra.gmra.mxu0 %vm74_vm3, %v453_v16 }
  0x14   :  { %447 = vmatprep.mubr.msk.bf16.mxu0 %vm471_vm1, %v470_v5  ;;  %432 = vmatpush3.bf16.msra.mxu0 %v462_v20 }
  0x15   :  { %433 = vmatprep.subr.bf16.mxu0 %v470_v5 }
  0x16   :  { %420 = vmatpush3.bf16.msra.mxu1 %v458_v15 }
  0x17   :  { %421 = vmatprep.subr.bf16.mxu1 %v470_v5 }
  0x18   :  { %434 = vmatpush3.bf16.msra.mxu0 %v463_v21 }
  0x19   :  { %435 = vmatprep.subr.bf16.mxu0 %v470_v5 }
  0x1a   :  { %422 = vmatpush3.bf16.msra.mxu1 %v459_v17 }
  0x1b   :  { %423 = vmatprep.subr.bf16.mxu1 %v470_v5 }
  0x1c   :  { %436 = vmatpush3.bf16.msra.mxu0 %v464_v22 }
  0x1d   :  { %437 = vmatprep.subr.bf16.mxu0 %v470_v5 }
  0x1e   :  { %424 = vmatpush3.bf16.msra.mxu1 %v460_v18 }
  0x1f   :  { %425 = vmatprep.subr.bf16.mxu1 %v470_v5 }
  0x20   :  { %438 = vmatpush3.bf16.msra.mxu0 %v465_v23 }
  0x21   :  { %439 = vmatprep.subr.bf16.mxu0 %v470_v5 }
  0x22   :  { %426 = vmatpush3.bf16.msra.mxu1 %v461_v19 }
  0x24   :  { %440 = vmatpush3.bf16.msra.mxu0 %v466_v24 }
  0x25   :  { %441 = vmatprep.subr.bf16.mxu0 %v470_v5 }
  0x28   :  { %442 = vmatpush3.bf16.msra.mxu0 %v467_v35 }
  0x29   :  { %443 = vmatprep.subr.bf16.mxu0 %v470_v5 }
  0x2c   :  { %444 = vmatpush3.bf16.msra.mxu0 %v468_v36 }
  0x2d   :  { %445 = vmatprep.subr.bf16.mxu0 %v470_v5 }
  0x30   :  { %446 = vmatpush3.bf16.msra.mxu0 %v469_v37 }
  0xd3   :  { %v116_v26 = vpop.f32.mrf.mxu0 }
  0xd4   :  { %v117_v28 = vadd.f32 %v359_v25, %v116_v26 }
  0xd5   :  { %v409_v27 = vpop.f32.mrf.mxu0 }
  0xd6   :  { %v123_v32 = vmax.f32 %v117_v28, 0.0 }
  0xd7   :  { %v119_v29 = vpop.f32.mrf.mxu0 }
  0xd8   :  { %v120_v30 = vadd.f32 %v359_v25, %v119_v29 }
  0xd9   :  { %v410_v31 = vpop.f32.mrf.mxu0 }
  0xda   :  { %v124_v33 = vmax.f32 %v120_v30, 0.0 }
  0xdc   :  { %v125_v34 = vpack.c.bf16 %v124_v33, %v123_v32 }
  0xde   :  { %428 = vmatmul.mubr.bf16.vlgmr.msra.gmra.mxu1 %v125_v34 }
 0x19e   :  { %v231_v39 = vpop.f32.mrf.mxu1 }
 0x19f   :  { %v232_v41 = vadd.f32 %v362_v38, %v231_v39 }
 0x1a0   :  { %v429_v40 = vpop.f32.mrf.mxu1 }
 0x1a1   :  { %v238_v45 = vmax.f32 %v232_v41, 0.0 }
 0x1a2   :  { %v234_v42 = vpop.f32.mrf.mxu1 }
 0x1a3   :  { %v235_v43 = vadd.f32 %v362_v38, %v234_v42 }
 0x1a4   :  { %v430_v44 = vpop.f32.mrf.mxu1 }
 0x1a5   :  { %v239_v46 = vmax.f32 %v235_v43, 0.0 }
 0x1a7   :  { %v240_v47 = vpack.c.bf16 %v239_v46, %v238_v45 }
 0x1a9   :  { %448 = vmatmul.mubr.bf16.vlgmr.msra.gmra.mxu0 %v240_v47 }
 0x269   :  { %v346_v49 = vpop.f32.mrf.mxu0 }
 0x26a   :  { %v347_v50 = vadd.f32 %v371_v48, %v346_v49 }
 0x26b   :  { %v449_v51 = vpop.f32.mrf.mxu0 }
 0x26c   :  { %353 = vst.msk [vmem:[%s623_s8] sm:$0xff] %vm74_vm3, %v347_v50 }
 0x26d   :  { %v349_v52 = vpop.f32.mrf.mxu0 }
 0x26e   :  { %v350_v53 = vadd.f32 %v371_v48, %v349_v52 }
 0x26f   :  { %v450_v54 = vpop.f32.mrf.mxu0 }
 0x270   :  { %354 = vst.msk [vmem:[%s623_s8 + $0x8] sm:$0xff] %vm74_vm3, %v350_v53 }

</bundles_post_ra>
